<compile_context>
chip_gen: v7x
topology: tpu7x:2x2x1
jax: 0.10.0
libtpu: 0.0.40
codegen_flags: <defaults>
</compile_context>

<pallas_src>
import math

import jax
import jax.numpy as jnp
import numpy as np
from jax.experimental import pallas as pl
from jax.experimental.pallas import tpu as pltpu


# ---------------------------------------------------------------------------
# Kernel: fused LayerNorm over the last axis for one block of rows
# ---------------------------------------------------------------------------
def _layernorm_kernel(params_ref, x_ref, o_ref):
    # params_ref: SMEM f32[3] = [alpha, bias, eps]
    # x_ref / o_ref: VMEM (block_rows, H) f32, H on the lane axis (lane-dense)
    x = x_ref[...]
    alpha = params_ref[0]
    bias = params_ref[1]
    eps = params_ref[2]

    h = x.shape[-1]
    mean = jnp.mean(x, axis=-1, keepdims=True)                    # (R, 1)
    centered = x - mean
    # torch.Tensor.std defaults to the unbiased estimator (divide by N-1).
    var = jnp.sum(centered * centered, axis=-1, keepdims=True) * (1.0 / (h - 1))
    std = jnp.sqrt(var)
    inv = pl.reciprocal(std + eps, approx=False)                  # EUP, exact
    o_ref[...] = alpha * centered * inv + bias


# ---------------------------------------------------------------------------
# Wrapper
# ---------------------------------------------------------------------------
def layer_norm(x, alpha, bias, eps=1e-5, *, block_rows=64):
    """LayerNorm over the last axis of `x` with scalar alpha / bias."""
    orig_shape = x.shape
    H = orig_shape[-1]
    R = math.prod(orig_shape[:-1])
    x2d = x.reshape(R, H).astype(jnp.float32)

    # Lane/sublane friendly tiling: H stays whole (multiple of 128), rows
    # tiled in multiples of 8.  Whole problem fits VMEM, so blocks are large.
    if R % block_rows != 0:
        block_rows = R  # fall back to a single block (still valid if R % 8 == 0)
    assert block_rows % 8 == 0 and H % 128 == 0, (block_rows, H)

    params = jnp.array([alpha, bias, eps], dtype=jnp.float32)

    out = pl.pallas_call(
        _layernorm_kernel,
        out_shape=jax.ShapeDtypeStruct((R, H), jnp.float32),
        grid_spec=pltpu.PrefetchScalarGridSpec(
            num_scalar_prefetch=0,
            grid=(R // block_rows,),
            in_specs=[
                pl.BlockSpec(memory_space=pltpu.MemorySpace.SMEM),   # [alpha,bias,eps]
                pl.BlockSpec((block_rows, H), lambda i: (i, 0)),
            ],
            out_specs=pl.BlockSpec((block_rows, H), lambda i: (i, 0)),
        ),
        compiler_params=pltpu.CompilerParams(
            dimension_semantics=("parallel",),   # lets v7x shard rows across TCs
        ),
    )(params, x2d)
    return out.reshape(orig_shape)


# ---------------------------------------------------------------------------
# Pure-JAX transcription of the PyTorch forward (verification reference)
# ---------------------------------------------------------------------------
def torch_reference(x, alpha, bias, eps):
    mean = jnp.mean(x, axis=-1, keepdims=True)
    n = x.shape[-1]
    var = jnp.sum((x - mean) ** 2, axis=-1, keepdims=True) / (n - 1)  # unbiased std
    std = jnp.sqrt(var)
    return alpha * (x - mean) / (std + eps) + bias


if __name__ == "__main__":
    B, S, H = 4, 32, 256          # rows = 128, hidden = 256 (lane-dense)
    eps = 1e-5

    key = jax.random.PRNGKey(0)
    kx, ka, kb = jax.random.split(key, 3)
    x = jax.random.normal(kx, (B, S, H), jnp.float32) * 3.0 + 0.5
    # nn.Parameter scalars (init ones(1)/zeros(1)); use non-trivial values here
    alpha = 1.0 + 0.5 * jax.random.normal(ka, ()).astype(jnp.float32)
    bias = 0.25 * jax.random.normal(kb, ()).astype(jnp.float32)

    out = jax.block_until_ready(layer_norm(x, alpha, bias, eps))

    ref = torch_reference(x, alpha, bias, eps)
    assert out.shape == x.shape, out.shape
    np.testing.assert_allclose(np.asarray(out), np.asarray(ref), rtol=1e-5, atol=1e-5)
    print("KERNEL_OK")
</pallas_src>

<mosaic_0001>
module attributes {stable_mosaic.version = 11 : i64} {
  func.func @_layernorm_kernel(%arg0: i32, %arg1: memref<3xf32, #tpu.memory_space<smem>>, %arg2: memref<64x256xf32, #tpu.memory_space<vmem>>, %arg3: memref<64x256xf32, #tpu.memory_space<vmem>>) attributes {dimension_semantics = [#tpu.dimension_semantics<parallel>], iteration_bounds = array<i64: 2>, scalar_prefetch = 0 : i64, scratch_operands = 0 : i64, tpu.core_type = #tpu.core_type<tc>, window_params = [{transform_indices = @transform_0, window_bounds = array<i64: 3>}, {transform_indices = @transform_1, window_bounds = array<i64: 64, 256>}, {transform_indices = @transform_2, window_bounds = array<i64: 64, 256>}]} {
    %c0 = arith.constant 0 : index
    %c0_0 = arith.constant 0 : index
    %0 = vector.load %arg2[%c0, %c0_0] : memref<64x256xf32, #tpu.memory_space<vmem>>, vector<64x256xf32>
    %c0_1 = arith.constant 0 : index
    %1 = memref.load %arg1[%c0_1] : memref<3xf32, #tpu.memory_space<smem>>
    %c1 = arith.constant 1 : index
    %2 = memref.load %arg1[%c1] : memref<3xf32, #tpu.memory_space<smem>>
    %c2 = arith.constant 2 : index
    %3 = memref.load %arg1[%c2] : memref<3xf32, #tpu.memory_space<smem>>
    %cst = arith.constant dense<0.000000e+00> : vector<64xf32>
    %4 = vector.multi_reduction <add>, %0, %cst [1] : vector<64x256xf32> to vector<64xf32>
    %5 = vector.shape_cast %4 : vector<64xf32> to vector<64x1xf32>
    %cst_2 = arith.constant 2.560000e+02 : f32
    %6 = vector.broadcast %cst_2 : f32 to vector<64x1xf32>
    %7 = arith.divf %5, %6 : vector<64x1xf32>
    %8 = vector.broadcast %7 : vector<64x1xf32> to vector<64x256xf32>
    %9 = arith.subf %0, %8 : vector<64x256xf32>
    %10 = arith.mulf %9, %9 : vector<64x256xf32>
    %cst_3 = arith.constant dense<0.000000e+00> : vector<64xf32>
    %11 = vector.multi_reduction <add>, %10, %cst_3 [1] : vector<64x256xf32> to vector<64xf32>
    %12 = vector.shape_cast %11 : vector<64xf32> to vector<64x1xf32>
    %cst_4 = arith.constant 0.00392156886 : f32
    %13 = vector.broadcast %cst_4 : f32 to vector<64x1xf32>
    %14 = arith.mulf %12, %13 : vector<64x1xf32>
    %15 = math.sqrt %14 : vector<64x1xf32>
    %16 = vector.broadcast %3 : f32 to vector<64x1xf32>
    %17 = arith.addf %15, %16 : vector<64x1xf32>
    %18 = tpu.reciprocal %17 : vector<64x1xf32> -> vector<64x1xf32>
    %19 = vector.broadcast %1 : f32 to vector<64x256xf32>
    %20 = arith.mulf %19, %9 : vector<64x256xf32>
    %21 = vector.broadcast %18 : vector<64x1xf32> to vector<64x256xf32>
    %22 = arith.mulf %20, %21 : vector<64x256xf32>
    %23 = vector.broadcast %2 : f32 to vector<64x256xf32>
    %24 = arith.addf %22, %23 : vector<64x256xf32>
    %c0_5 = arith.constant 0 : index
    %c0_6 = arith.constant 0 : index
    %25 = vector.load %arg3[%c0_5, %c0_6] : memref<64x256xf32, #tpu.memory_space<vmem>>, vector<64x256xf32>
    tpu.vector_store %arg3[%c0_5, %c0_6], %24 {strides = array<i32>} : memref<64x256xf32, #tpu.memory_space<vmem>>, vector<64x256xf32>,
    return
  }
  func.func @transform_0(%arg0: i32) -> i32 {
    %c0_i32 = arith.constant 0 : i32
    %c0_i32_0 = arith.constant 0 : i32
    return %c0_i32 : i32
  }
  func.func @transform_1(%arg0: i32) -> (i32, i32) {
    %c0_i32 = arith.constant 0 : i32
    %c0_i32_0 = arith.constant 0 : i32
    return %arg0, %c0_i32 : i32, i32
  }
  func.func @transform_2(%arg0: i32) -> (i32, i32) {
    %c0_i32 = arith.constant 0 : i32
    %c0_i32_0 = arith.constant 0 : i32
    return %arg0, %c0_i32 : i32, i32
  }
}

</mosaic_0001>

<bundles_post_ra>
// kernel: tpu_custom_call.1
= control target key start
LH: loop header
LB: loop body
LE: loop exit
PB: predicated region body
PF: predicated region fallthrough
CT: control target
= control target key end

     0   :  { %7 = vsyncpa [#allocation5], 0  ;;  %s1157_s0 = inlined_call_operand.hbm [shape: f32[3], index: 0, kind: input, shape index: {}]   ;;  %s1158_s1 = inlined_call_operand.hbm [shape: f32[128,256], index: 1, kind: input, shape index: {}]   ;;  %s1159_s2 = inlined_call_operand.hbm [shape: f32[128,256], index: 2, kind: output, shape index: {}]  }
   0x1   :  { %8 = vsyncpa [#allocation3], 0 }
   0x2   :  { %10 = vsyncpa [#allocation3 + $0x1], 0 }
   0x3   :  { %11 = vsyncpa [#allocation4], 0 }
   0x4   :  { %13 = vsyncpa [#allocation4 + $0x1], 0  ;;  %s786_s9 = smov 0   ;;  %s788_s10 = smov 0  }
   0x5   :  { %s790_s11 = smov 0   ;;  %s792_s12 = smov 0  }
   0x6 LB: > { %s807_s13 = sadd.s32 4294967295, %s762_s12   ;;  %s532_s14 = sadd.s32 4294967294, %s762_s12   ;;  %s762_s12 = sphi %s792_s12, %s1179_s12   ;;  %s758_s11 = sphi %s790_s11, %s1178_s11   ;;  %s754_s10 = sphi %s788_s10, %s1177_s10   ;;  %s750_s9 = sphi %s786_s9, %s1176_s9  }
   0x7   : > { %s811_s15 = sadd.s32 1, %s762_s12   ;;  %s47_s16 = sadd.s32 1, %s758_s11 }
   0x8   : > { %s44_s17 = ssub.s32 %s762_s12, %s811_s15  ;;  %p54_p0 = scmp.ne.s32.totalorder %s758_s11, %s754_s10 }
   0x9   : > { %p45_p1 = scmp.eq.s32.totalorder %s44_s17, 0  ;;  %p55_p2 = scmp.eq.s32.totalorder %s762_s12, 0 }
   0xa   : > { %p60_p3 = scmp.ne.s32.totalorder %s754_s10, %s750_s9  ;;  %p1160_p4 = scmp.eq.s32.totalorder %s807_s13, 0 }
   0xb   : > { %s823_s18 = scalar_select %p45_p1, %s758_s11, %s47_s16  }
   0xc   : > { %p825_p5 = por %p55_p2, %p54_p0  ;;  %p831_p6 = por %p1160_p4, %p60_p3 }
   0xd   : > { %p84_p7 = scmp.eq.s32.totalorder %s807_s13, 1  ;;  %p90_p8 = scmp.eq.s32.totalorder %s532_s14, 1 }
   0xe   : > { %s1164_s20 = scalar_select %p831_p6, 1, 0 }
   0xf   : > { %p533_p9 = scmp.ge.s32.totalorder %s762_s12, 1  ;;  %p97_p10 = scmp.lt.s32.totalorder %s762_s12, 3 }
  0x10   : > { %p838_p11 = por %p84_p7, %p54_p0  ;;  %p842_p12 = por %p90_p8, %p60_p3 }
  0x11   : > { %p846_p13 = pnand %p533_p9, %p97_p10  ;;  %p577_p4 = scmp.lt.s32.totalorder %s762_s12, 2 }
  0x12   : > { %s1165_s21 = scalar_select %p838_p11, 1, 0 }
  0x13   : > { %s1166_s22 = scalar_select %p842_p12, 1, 0 }
  0x14   : > { %p564_p2 = pneg %p846_p13  ;;  %s119_s24 = sand.u32 1, %s758_s11  }
  0x15   : > { %s553_s25 = sshll.u32 %s762_s12, 11  ;;  %p1168_p6 = scmp.eq.s32.totalorder %s807_s13, 0 }
  0x16   : > { %p860_p7 = pnand %p577_p4, %p825_p5  ;;  %s536_s27 = sshll.u32 %s119_s24, 7 }
  0x17   : > { %p565_p0 = pnand %p564_p2, %p1168_p6  ;;  %s649_s30 = scalar_lea.hbm %s1157_s0, 16 }
  0x18   : > { %p650_p3 = scmp.ne.s32.totalorder %s1157_s0, %s649_s30  ;;  %p656_p6 = scmp.lt.u32.totalorder %s649_s30, %s1157_s0 }
  0x19   : > { %p651_p8 = pneg %p565_p0 }
  0x1b   : > { %p652_p9 = pnand %p651_p8, %p650_p3 }
  0x1d   : > { %p653_p10 = pneg %p652_p9 }
  0x1f   : > { %p658_p4 = pnand %p656_p6, %p653_p10 }
  0x21   : > { %661 = shalt.err (!%p658_p4)
}
  0x22   : > { %s764_s7 = smov [#allocation2]   ;;  %s879_s19 = scalar_lea.hbm %s1158_s1, %s553_s25 }
  0x23   : > { %567 = dma.hbm_to_smem (!%p565_p0), %s1157_s0, 16, %s764_s7, [#allocation5]  }
  0x24   : > { %s123_s28 = scalar_lea.vmem [#allocation6], %s536_s27  ;;  %s883_s30 = scalar_lea.sflag [#allocation3], %s119_s24 }
  0x25   : > { %s131_s29 = sshll.u32 %s123_s28, 4  ;;  %s662_s3 = scalar_lea.hbm %s879_s19, 2048  ;;  %s881_s29 = int_to_ptr.vmem [resolvable:$true] %s131_s29 }
  0x26   : > { %p663_p5 = scmp.ne.s32.totalorder %s879_s19, %s662_s3  ;;  %p664_p2 = pneg %p860_p7 }
  0x27   : > { %s667_s5 = scalar_lea.hbm %s1158_s1, 4096  ;;  %p668_p8 = scmp.lt.u32.totalorder %s879_s19, %s1158_s1 }
  0x28   : > { %p665_p0 = pnand %p664_p2, %p663_p5  ;;  %p669_p9 = scmp.lt.u32.totalorder %s667_s5, %s662_s3 }
  0x29   : > { %p671_p6 = scmp.lt.u32.totalorder %s662_s3, %s879_s19 }
  0x2a   : > { %p666_p3 = pneg %p665_p0  ;;  %p670_p10 = por %p669_p9, %p668_p8 }
  0x2c   : > { %p672_p4 = por %p671_p6, %p670_p10 }
  0x2e   : > { %p673_p1 = pnand %p672_p4, %p666_p3 }
  0x30   : > { %676 = shalt.err (!%p673_p1)
}
  0x31   : > { %s677_s24 = scalar_lea.vmem %s881_s29, 2048  ;;  %s765_s27 = smov [#allocation6]  }
  0x32   : > { %p678_p5 = scmp.ne.s32.totalorder %s881_s29, %s677_s24  ;;  %s682_s8 = sshll.u32 %s765_s27, 4  ;;  %s683_s8 = int_to_ptr.vmem [resolvable:$false] %s682_s8 }
  0x33   : > { %s684_s14 = scalar_lea.vmem %s683_s8, 4096  ;;  %p685_p11 = scmp.lt.s32.totalorder %s881_s29, %s683_s8 }
  0x34   : > { %p680_p0 = pnand %p678_p5, %p664_p2  ;;  %p686_p8 = scmp.lt.s32.totalorder %s684_s14, %s677_s24 }
  0x36   : > { %p681_p12 = pneg %p680_p0  ;;  %p687_p9 = por %p686_p8, %p685_p11 }
  0x38   : > { %p688_p10 = pnand %p687_p9, %p681_p12 }
  0x3a   : > { %691 = shalt.err (!%p688_p10)
}
  0x3b   : > { %s766_s16 = smov 256   ;;  %s767_s17 = smov 16  }
  0x3c   : > { %571 = dma.hbm_to_vmem [thread:$0]  (!%p860_p7), %s879_s19, 2048, %s881_s29, %s883_s30, %s766_s16, %s766_s16, %s767_s17  }
  0x3d   : > { %143 = sbr.rel (%p846_p13) target bundleno = 437 (0x1b5), region = 28  ;;  %p1170_p1 = scmp.eq.s32.totalorder (!%p846_p13), %s807_s13, 0 }
  0x44   : > { %737 = dma.done.wait (%p1170_p1), [#allocation5], 16   ;;  %p1171_p2 = pmov %p1170_p1 }
  0x45   : > { %s918_s28 = sand.u32 1, %s754_s10   ;;  %p1172_p11 = scmp.ne.s32.totalorder %s1164_s20, 0 }
  0x46   : > { %739 = vsyncadd (%p1171_p2), [#allocation5], 4294967280  ;;  %s542_s3 = sshll.u32 %s918_s28, 7  ;;  %s150_s25 = scalar_lea.sflag [#allocation3], %s918_s28 }
  0x47   : > { %s153_s26 = scalar_lea.vmem [#allocation6], %s542_s3 }
  0x48   : > { %741 = dma.done.wait (%p1172_p11), %s150_s25, 2048  }
  0x49   : > { %743 = vsyncadd (%p1172_p11), %s150_s25, 4294965248 }
  0x4a   : > { %158 = sfence }
  0x4b   : > { %v177_v0 = vld [vmem:[%s153_s26] sm:$0xff]  ;;  %v178_v1 = vld [vmem:[%s153_s26 + $0x8] sm:$0xff]  ;;  %v179_v5 = vld [vmem:[%s153_s26 + $0x10] sm:$0xff]  ;;  %s545_s20 = sld [smem:[#allocation2 + $0x2]]  ;;  %s193_s23 = sld [smem:[#allocation2]] }
  0x4c   : > { %v181_v2 = vld [vmem:[%s153_s26 + $0x20] sm:$0xff]  ;;  %v196_v3 = vadd.f32 %v178_v1, %v177_v0  ;;  %v182_v4 = vld [vmem:[%s153_s26 + $0x28] sm:$0xff]  ;;  %v180_v6 = vld [vmem:[%s153_s26 + $0x18] sm:$0xff]  ;;  %s544_s19 = sld [smem:[#allocation2 + $0x1]]  ;;  %s1053_s29 = scalar_lea.vmem [#allocation7], %s542_s3 }
  0x4d   : > { %v202_v7 = vadd.f32 %v182_v4, %v181_v2  ;;  %v183_v8 = vld [vmem:[%s153_s26 + $0x30] sm:$0xff]  ;;  %v184_v9 = vld [vmem:[%s153_s26 + $0x38] sm:$0xff]  ;;  %v199_v10 = vadd.f32 %v180_v6, %v179_v5  ;;  %v185_v12 = vld [vmem:[%s153_s26 + $0x40] sm:$0xff]  ;;  %s555_s30 = sshll.u32 %s807_s13, 11  ;;  %s447_s4 = sshll.u32 %s1053_s29, 4  ;;  %s1109_s4 = int_to_ptr.vmem [resolvable:$true] %s447_s4 }
  0x4e   : > { %197 = vadd.xlane.f32.xlu0 %v196_v3  ;;  %v205_v11 = vadd.f32 %v184_v9, %v183_v8  ;;  %v186_v13 = vld [vmem:[%s153_s26 + $0x48] sm:$0xff]  ;;  %v187_v14 = vld [vmem:[%s153_s26 + $0x50] sm:$0xff]  ;;  %v188_v15 = vld [vmem:[%s153_s26 + $0x58] sm:$0xff]  ;;  %s1107_s7 = scalar_lea.hbm %s1159_s2, %s555_s30  ;;  %s433_s13 = scalar_lea.sflag [#allocation4], %s918_s28 }
  0x4f   : > { %203 = vadd.xlane.f32.xlu1 %v202_v7  ;;  %v208_v16 = vadd.f32 %v186_v13, %v185_v12  ;;  %v211_v17 = vadd.f32 %v188_v15, %v187_v14  ;;  %v189_v18 = vld [vmem:[%s153_s26 + $0x60] sm:$0xff]  ;;  %v190_v19 = vld [vmem:[%s153_s26 + $0x68] sm:$0xff]  ;;  %v191_v20 = vld [vmem:[%s153_s26 + $0x70] sm:$0xff]  ;;  %s692_s24 = scalar_lea.vmem %s1109_s4, 2048  ;;  %p1173_p13 = scmp.ne.s32.totalorder %s1165_s21, 0 }
  0x50   : > { %v192_v21 = vld [vmem:[%s153_s26 + $0x78] sm:$0xff]  ;;  %v214_v22 = vadd.f32 %v190_v19, %v189_v18  ;;  %p693_p12 = scmp.ne.s32.totalorder %s1109_s4, %s692_s24  ;;  %s768_s27 = smov [#allocation7]  }
  0x51   : > { %v217_v23 = vadd.f32 %v192_v21, %v191_v20  ;;  %s696_s8 = sshll.u32 %s768_s27, 4  ;;  %s697_s8 = int_to_ptr.vmem [resolvable:$false] %s696_s8 }
  0x52   : > { %200 = vadd.xlane.f32.xlu0 %v199_v10  ;;  %p694_p7 = pnand %p693_p12, %p1173_p13  ;;  %s698_s14 = scalar_lea.vmem %s697_s8, 4096 }
  0x53   : > { %206 = vadd.xlane.f32.xlu1 %v205_v11  ;;  %p699_p6 = scmp.lt.s32.totalorder %s1109_s4, %s697_s8  ;;  %p700_p4 = scmp.lt.s32.totalorder %s698_s14, %s692_s24 }
  0x54   : > { %p695_p3 = pneg %p694_p7 }
  0x55   : > { %p701_p5 = por %p700_p4, %p699_p6 }
  0x56   : > { %209 = vadd.xlane.f32.xlu0 %v208_v16 }
  0x57   : > { %212 = vadd.xlane.f32.xlu1 %v211_v17  ;;  %p702_p0 = pnand %p701_p5, %p695_p3 }
  0x5a   : > { %215 = vadd.xlane.f32.xlu0 %v214_v22 }
  0x5b   : > { %218 = vadd.xlane.f32.xlu1 %v217_v23 }
  0xdb   : > { %v198_v24 = vpop.xlane.xlu0 %197 }
  0xdc   : > { %v221_v25 = vmul.f32 0.00390625, %v198_v24  ;;  %v204_v26 = vpop.xlane.xlu1 %203 }
  0xdd   : > { %v223_v27 = vmul.f32 0.00390625, %v204_v26 }
  0xde   : > { %v928_v28 = vsub.f32 %v177_v0, %v221_v25  ;;  %v930_v29 = vsub.f32 %v178_v1, %v221_v25 }
  0xdf   : > { %v932_v30 = vsub.f32 %v181_v2, %v223_v27  ;;  %v934_v31 = vsub.f32 %v182_v4, %v223_v27  ;;  %v201_v32 = vpop.xlane.xlu0 %200 }
  0xe0   : > { %v222_v33 = vmul.f32 0.00390625, %v201_v32  ;;  %v207_v34 = vpop.xlane.xlu1 %206  ;;  %v245_v35 = vmul.f32 %v928_v28, %v928_v28  ;;  %v246_v37 = vmul.f32 %v930_v29, %v930_v29 }
  0xe1   : > { %v224_v36 = vmul.f32 0.00390625, %v207_v34  ;;  %v249_v40 = vmul.f32 %v932_v30, %v932_v30  ;;  %v250_v41 = vmul.f32 %v934_v31, %v934_v31 }
  0xe2   : > { %v940_v38 = vsub.f32 %v179_v5, %v222_v33  ;;  %v942_v39 = vsub.f32 %v180_v6, %v222_v33  ;;  %v261_v45 = vadd.f32 %v246_v37, %v245_v35 }
  0xe3   : > { %v948_v42 = vsub.f32 %v183_v8, %v224_v36  ;;  %v950_v43 = vsub.f32 %v184_v9, %v224_v36  ;;  %v210_v44 = vpop.xlane.xlu0 %209  ;;  %v267_v49 = vadd.f32 %v250_v41, %v249_v40  ;;  %v999_v36 = vstv %s545_s20 }
  0xe4   : > { %v225_v46 = vmul.f32 0.00390625, %v210_v44  ;;  %v213_v47 = vpop.xlane.xlu1 %212  ;;  %262 = vadd.xlane.f32.xlu0 %v261_v45  ;;  %v247_v50 = vmul.f32 %v940_v38, %v940_v38  ;;  %v248_v53 = vmul.f32 %v942_v39, %v942_v39  ;;  %v1002_v44 = vstv %s193_s23 }
  0xe5   : > { %v226_v48 = vmul.f32 0.00390625, %v213_v47  ;;  %v251_v54 = vmul.f32 %v948_v42, %v948_v42  ;;  %v252_v58 = vmul.f32 %v950_v43, %v950_v43 }
  0xe6   : > { %v954_v51 = vsub.f32 %v185_v12, %v225_v46  ;;  %v956_v52 = vsub.f32 %v186_v13, %v225_v46  ;;  %v264_v60 = vadd.f32 %v248_v53, %v247_v50 }
  0xe7   : > { %v962_v55 = vsub.f32 %v187_v14, %v226_v48  ;;  %v964_v56 = vsub.f32 %v188_v15, %v226_v48  ;;  %v216_v57 = vpop.xlane.xlu0 %215  ;;  %v270_v63 = vadd.f32 %v252_v58, %v251_v54  ;;  %v1005_v48 = vstv %s544_s19 }
  0xe8   : > { %v227_v59 = vmul.f32 0.00390625, %v216_v57  ;;  %v219_v61 = vpop.xlane.xlu1 %218  ;;  %268 = vadd.xlane.f32.xlu0 %v267_v49  ;;  %265 = vadd.xlane.f32.xlu1 %v264_v60  ;;  %v253_v2 = vmul.f32 %v954_v51, %v954_v51  ;;  %v254_v3 = vmul.f32 %v956_v52, %v956_v52 }
  0xe9   : > { %v228_v62 = vmul.f32 0.00390625, %v219_v61  ;;  %v255_v6 = vmul.f32 %v962_v55, %v962_v55  ;;  %v256_v7 = vmul.f32 %v964_v56, %v964_v56 }
  0xea   : > { %v968_v0 = vsub.f32 %v189_v18, %v227_v59  ;;  %v970_v1 = vsub.f32 %v190_v19, %v227_v59  ;;  %v273_v8 = vadd.f32 %v254_v3, %v253_v2  ;;  %v368_v2 = vmul.f32 %v1002_v44, %v930_v29 }
  0xeb   : > { %v976_v4 = vsub.f32 %v191_v20, %v228_v62  ;;  %v978_v5 = vsub.f32 %v192_v21, %v228_v62  ;;  %v276_v11 = vadd.f32 %v256_v7, %v255_v6 }
  0xec   : > { %v257_v9 = vmul.f32 %v968_v0, %v968_v0  ;;  %v258_v10 = vmul.f32 %v970_v1, %v970_v1  ;;  %271 = vadd.xlane.f32.xlu1 %v270_v63  ;;  %274 = vadd.xlane.f32.xlu0 %v273_v8  ;;  %v367_v63 = vmul.f32 %v1002_v44, %v928_v28 }
  0xed   : > { %v259_v12 = vmul.f32 %v976_v4, %v976_v4  ;;  %v260_v13 = vmul.f32 %v978_v5, %v978_v5  ;;  %v371_v8 = vmul.f32 %v1002_v44, %v932_v30 }
  0xee   : > { %v279_v14 = vadd.f32 %v258_v10, %v257_v9 }
  0xef   : > { %v282_v15 = vadd.f32 %v260_v13, %v259_v12 }
  0xf0   : > { %277 = vadd.xlane.f32.xlu1 %v276_v11  ;;  %280 = vadd.xlane.f32.xlu0 %v279_v14  ;;  %v372_v14 = vmul.f32 %v1002_v44, %v934_v31 }
  0xf4   : > { %283 = vadd.xlane.f32.xlu1 %v282_v15 }
 0x171   : > { %v263_v16 = vpop.xlane.xlu0 %262 }
 0x172   : > { %v285_v17 = vmul.f32 0.003921569, %v263_v16 }
 0x174   : > { %617 = vrsqrt.f32 %v285_v17  ;;  %vm295_vm0 = vcmp.eq.f32.partialorder %v285_v17, inf  ;;  %v298_v37 = vand.u32 2147483648, %v285_v17  ;;  %vm297_vm1 = vcmp.eq.f32.partialorder %v285_v17, 0.0 }
 0x175   : > { %v269_v18 = vpop.xlane.xlu0 %268  ;;  %v266_v19 = vpop.xlane.xlu1 %265 }
 0x176   : > { %v287_v20 = vmul.f32 0.003921569, %v269_v18  ;;  %v286_v21 = vmul.f32 0.003921569, %v266_v19 }
 0x178   : > { %619 = vrsqrt.f32 %v287_v20  ;;  %vm309_vm2 = vcmp.eq.f32.partialorder %v287_v20, inf  ;;  %vm311_vm3 = vcmp.eq.f32.partialorder %v287_v20, 0.0  ;;  %v312_v54 = vand.u32 2147483648, %v287_v20 }
 0x179   : > { %621 = vrsqrt.f32 %v286_v21  ;;  %v272_v22 = vpop.xlane.xlu1 %271  ;;  %v275_v23 = vpop.xlane.xlu0 %274  ;;  %vm302_vm4 = vcmp.eq.f32.partialorder %v286_v21, inf  ;;  %v305_v58 = vand.u32 2147483648, %v286_v21  ;;  %vm304_vm5 = vcmp.eq.f32.partialorder %v286_v21, 0.0 }
 0x17a   : > { %v288_v24 = vmul.f32 0.003921569, %v272_v22  ;;  %v992_v25 = vmul.f32 0.003921569, %v275_v23 }
 0x17c   : > { %623 = vrsqrt.f32 %v288_v24  ;;  %vm316_vm6 = vcmp.eq.f32.partialorder %v288_v24, inf  ;;  %vm318_vm7 = vcmp.eq.f32.partialorder %v288_v24, 0.0  ;;  %v319_v11 = vand.u32 2147483648, %v288_v24 }
 0x17d   : > { %625 = vrsqrt.f32 %v992_v25  ;;  %v278_v27 = vpop.xlane.xlu1 %277  ;;  %v281_v32 = vpop.xlane.xlu0 %280  ;;  %vm323_vm8 = vcmp.eq.f32.partialorder %v992_v25, inf  ;;  %v326_v29 = vand.u32 2147483648, %v992_v25  ;;  %vm325_vm9 = vcmp.eq.f32.partialorder %v992_v25, 0.0 }
 0x17e   : > { %v618_v26 = vpop.eup %617  ;;  %v995_v34 = vmul.f32 0.003921569, %v278_v27  ;;  %v997_v35 = vmul.f32 0.003921569, %v281_v32 }
 0x17f   : > { %v294_v33 = vmul.f32 %v618_v26, %v285_v17 }
 0x180   : > { %627 = vrsqrt.f32 %v995_v34  ;;  %vm330_vm10 = vcmp.eq.f32.partialorder %v995_v34, inf  ;;  %vm332_vm11 = vcmp.eq.f32.partialorder %v995_v34, 0.0  ;;  %vm337_vm12 = vcmp.eq.f32.partialorder %v997_v35, inf }
 0x181   : > { %v296_v40 = vsel %vm295_vm0, %v285_v17, %v294_v33  ;;  %629 = vrsqrt.f32 %v997_v35  ;;  %v284_v46 = vpop.xlane.xlu1 %283  ;;  %v340_v23 = vand.u32 2147483648, %v997_v35  ;;  %vm339_vm13 = vcmp.eq.f32.partialorder %v997_v35, 0.0 }
 0x182   : > { %v620_v41 = vpop.eup %619  ;;  %v299_v45 = vsel %vm297_vm1, %v298_v37, %v296_v40  ;;  %v1008_v57 = vmul.f32 0.003921569, %v284_v46 }
 0x183   : > { %v622_v47 = vpop.eup %621  ;;  %v350_v49 = vadd.f32 %v999_v36, %v299_v45  ;;  %v308_v50 = vmul.f32 %v620_v41, %v287_v20 }
 0x184   : > { %v301_v53 = vmul.f32 %v622_v47, %v286_v21  ;;  %vm344_vm14 = vcmp.eq.f32.partialorder %v1008_v57, inf  ;;  %v347_v47 = vand.u32 2147483648, %v1008_v57  ;;  %vm346_vm15 = vcmp.eq.f32.partialorder %v1008_v57, 0.0 }
 0x185   : > { %631 = vrcp.f32 %v350_v49  ;;  %v310_v59 = vsel %vm309_vm2, %v287_v20, %v308_v50  ;;  %v370_v50 = vmul.f32 %v1002_v44, %v942_v39 }
 0x186   : > { %v303_v60 = vsel %vm302_vm4, %v286_v21, %v301_v53  ;;  %v313_v61 = vsel %vm311_vm3, %v312_v54, %v310_v59  ;;  %633 = vrsqrt.f32 %v1008_v57  ;;  %v624_v62 = vpop.eup %623  ;;  %v333_v21 = vand.u32 2147483648, %v995_v34 }
 0x187   : > { %v306_v3 = vsel %vm304_vm5, %v305_v58, %v303_v60  ;;  %v352_v6 = vadd.f32 %v999_v36, %v313_v61  ;;  %v626_v7 = vpop.eup %625  ;;  %v315_v10 = vmul.f32 %v624_v62, %v288_v24 }
 0x188   : > { %v351_v9 = vadd.f32 %v999_v36, %v306_v3  ;;  %v322_v12 = vmul.f32 %v626_v7, %v992_v25 }
 0x189   : > { %635 = vrcp.f32 %v352_v6  ;;  %v317_v28 = vsel %vm316_vm6, %v288_v24, %v315_v10 }
 0x18a   : > { %637 = vrcp.f32 %v351_v9  ;;  %v628_v13 = vpop.eup %627  ;;  %v320_v30 = vsel %vm318_vm7, %v319_v11, %v317_v28  ;;  %v324_v15 = vsel %vm323_vm8, %v992_v25, %v322_v12  ;;  %v377_v12 = vmul.f32 %v1002_v44, %v962_v55 }
 0x18b   : > { %v630_v16 = vpop.eup %629  ;;  %v353_v17 = vadd.f32 %v999_v36, %v320_v30  ;;  %v327_v18 = vsel %vm325_vm9, %v326_v29, %v324_v15  ;;  %v329_v19 = vmul.f32 %v628_v13, %v995_v34  ;;  %v379_v13 = vmul.f32 %v1002_v44, %v968_v0 }
 0x18c   : > { %v354_v20 = vadd.f32 %v999_v36, %v327_v18  ;;  %v336_v31 = vmul.f32 %v630_v16, %v997_v35 }
 0x18d   : > { %639 = vrcp.f32 %v353_v17  ;;  %v331_v22 = vsel %vm330_vm10, %v995_v34, %v329_v19  ;;  %v369_v34 = vmul.f32 %v1002_v44, %v940_v38  ;;  %v381_v19 = vmul.f32 %v1002_v44, %v976_v4 }
 0x18e   : > { %641 = vrcp.f32 %v354_v20  ;;  %v334_v25 = vsel %vm332_vm11, %v333_v21, %v331_v22  ;;  %v338_v26 = vsel %vm337_vm12, %v997_v35, %v336_v31  ;;  %v382_v20 = vmul.f32 %v1002_v44, %v978_v5 }
 0x18f   : > { %v632_v24 = vpop.eup %631  ;;  %v355_v37 = vadd.f32 %v999_v36, %v334_v25  ;;  %v341_v40 = vsel %vm339_vm13, %v340_v23, %v338_v26 }
 0x190   : > { %v634_v27 = vpop.eup %633  ;;  %v383_v32 = vmul.f32 %v632_v24, %v367_v63  ;;  %v384_v33 = vmul.f32 %v632_v24, %v368_v2  ;;  %v356_v41 = vadd.f32 %v999_v36, %v341_v40  ;;  %v374_v2 = vmul.f32 %v1002_v44, %v950_v43 }
 0x191   : > { %v343_v45 = vmul.f32 %v634_v27, %v1008_v57  ;;  %643 = vrcp.f32 %v355_v37 }
 0x192   : > { %v400_v46 = vadd.f32 %v1005_v48, %v383_v32  ;;  %v401_v35 = vadd.f32 %v1005_v48, %v384_v33  ;;  %645 = vrcp.f32 %v356_v41 }
 0x193   : > { %v636_v49 = vpop.eup %635  ;;  %v345_v38 = vsel %vm344_vm14, %v1008_v57, %v343_v45  ;;  %v373_v57 = vmul.f32 %v1002_v44, %v948_v42 }
 0x194   : > { %v638_v53 = vpop.eup %637  ;;  %416 = vst [vmem:[%s1053_s29] sm:$0xff] %v400_v46  ;;  %417 = vst [vmem:[%s1053_s29 + $0x8] sm:$0xff] %v401_v35  ;;  %v387_v54 = vmul.f32 %v636_v49, %v371_v8  ;;  %v388_v58 = vmul.f32 %v636_v49, %v372_v14  ;;  %v348_v59 = vsel %vm346_vm15, %v347_v47, %v345_v38 }
 0x195   : > { %v385_v60 = vmul.f32 %v638_v53, %v369_v34  ;;  %v386_v39 = vmul.f32 %v638_v53, %v370_v50  ;;  %v357_v61 = vadd.f32 %v999_v36, %v348_v59  ;;  %v375_v8 = vmul.f32 %v1002_v44, %v954_v51 }
 0x196   : > { %v404_v62 = vadd.f32 %v1005_v48, %v387_v54  ;;  %v405_v63 = vadd.f32 %v1005_v48, %v388_v58  ;;  %v376_v36 = vmul.f32 %v1002_v44, %v956_v52  ;;  %v378_v51 = vmul.f32 %v1002_v44, %v964_v56 }
 0x197   : > { %v402_v3 = vadd.f32 %v1005_v48, %v385_v60  ;;  %v403_v6 = vadd.f32 %v1005_v48, %v386_v39  ;;  %647 = vrcp.f32 %v357_v61  ;;  %v640_v7 = vpop.eup %639  ;;  %v380_v14 = vmul.f32 %v1002_v44, %v970_v1 }
 0x198   : > { %420 = vst [vmem:[%s1053_s29 + $0x20] sm:$0xff] %v404_v62  ;;  %421 = vst [vmem:[%s1053_s29 + $0x28] sm:$0xff] %v405_v63  ;;  %v642_v42 = vpop.eup %641  ;;  %v389_v43 = vmul.f32 %v640_v7, %v373_v57  ;;  %v390_v9 = vmul.f32 %v640_v7, %v374_v2 }
 0x199   : > { %418 = vst [vmem:[%s1053_s29 + $0x10] sm:$0xff] %v402_v3  ;;  %419 = vst [vmem:[%s1053_s29 + $0x18] sm:$0xff] %v403_v6  ;;  %v391_v10 = vmul.f32 %v642_v42, %v375_v8  ;;  %v392_v11 = vmul.f32 %v642_v42, %v376_v36 }
 0x19a   : > { %v406_v52 = vadd.f32 %v1005_v48, %v389_v43  ;;  %v407_v28 = vadd.f32 %v1005_v48, %v390_v9 }
 0x19b   : > { %v644_v29 = vpop.eup %643  ;;  %v408_v30 = vadd.f32 %v1005_v48, %v391_v10  ;;  %v409_v15 = vadd.f32 %v1005_v48, %v392_v11 }
 0x19c   : > { %v646_v55 = vpop.eup %645  ;;  %422 = vst [vmem:[%s1053_s29 + $0x30] sm:$0xff] %v406_v52  ;;  %423 = vst [vmem:[%s1053_s29 + $0x38] sm:$0xff] %v407_v28  ;;  %v393_v56 = vmul.f32 %v644_v29, %v377_v12  ;;  %v394_v16 = vmul.f32 %v644_v29, %v378_v51 }
 0x19d   : > { %424 = vst [vmem:[%s1053_s29 + $0x40] sm:$0xff] %v408_v30  ;;  %425 = vst [vmem:[%s1053_s29 + $0x48] sm:$0xff] %v409_v15  ;;  %v395_v0 = vmul.f32 %v646_v55, %v379_v13  ;;  %v396_v17 = vmul.f32 %v646_v55, %v380_v14 }
 0x19e   : > { %v410_v1 = vadd.f32 %v1005_v48, %v393_v56  ;;  %v411_v18 = vadd.f32 %v1005_v48, %v394_v16 }
 0x19f   : > { %v412_v21 = vadd.f32 %v1005_v48, %v395_v0  ;;  %v413_v31 = vadd.f32 %v1005_v48, %v396_v17 }
 0x1a0   : > { %426 = vst [vmem:[%s1053_s29 + $0x50] sm:$0xff] %v410_v1  ;;  %427 = vst [vmem:[%s1053_s29 + $0x58] sm:$0xff] %v411_v18 }
 0x1a1   : > { %v648_v22 = vpop.eup %647  ;;  %428 = vst [vmem:[%s1053_s29 + $0x60] sm:$0xff] %v412_v21  ;;  %429 = vst [vmem:[%s1053_s29 + $0x68] sm:$0xff] %v413_v31 }
 0x1a2   : > { %v397_v23 = vmul.f32 %v648_v22, %v381_v19  ;;  %v398_v4 = vmul.f32 %v648_v22, %v382_v20 }
 0x1a4   : > { %v414_v5 = vadd.f32 %v1005_v48, %v397_v23  ;;  %v415_v44 = vadd.f32 %v1005_v48, %v398_v4 }
 0x1a6   : > { %430 = vst [vmem:[%s1053_s29 + $0x70] sm:$0xff] %v414_v5  ;;  %431 = vst [vmem:[%s1053_s29 + $0x78] sm:$0xff] %v415_v44 }
 0x1a7   : > { %705 = shalt.err (!%p702_p0)
}
 0x1a8   : > { %s706_s16 = scalar_lea.hbm %s1107_s7, 2048  ;;  %s710_s25 = scalar_lea.hbm %s1159_s2, 4096 }
 0x1a9   : > { %p707_p8 = scmp.ne.s32.totalorder %s1107_s7, %s706_s16  ;;  %p711_p1 = scmp.lt.u32.totalorder %s1107_s7, %s1159_s2 }
 0x1aa   : > { %p712_p2 = scmp.lt.u32.totalorder %s710_s25, %s706_s16  ;;  %p714_p12 = scmp.lt.u32.totalorder %s706_s16, %s1107_s7 }
 0x1ab   : > { %p708_p9 = pnand %p707_p8, %p1173_p13 }
 0x1ac   : > { %p713_p11 = por %p712_p2, %p711_p1 }
 0x1ad   : > { %p709_p10 = pneg %p708_p9 }
 0x1ae   : > { %p715_p7 = por %p714_p12, %p713_p11 }
 0x1b0   : > { %p716_p3 = pnand %p715_p7, %p709_p10 }
 0x1b2   : > { %719 = shalt.err (!%p716_p3)
}
 0x1b3   : > { %s769_s23 = smov 256   ;;  %s770_s19 = smov 16  }
 0x1b4   : > { %562 = dma.vmem_to_hbm [thread:$0]  (%p1173_p13), %s1109_s4, 2048, %s1107_s7, %s433_s13, %s769_s23, %s769_s23, %s770_s19  }
 0x1b5 PF: > { %s462_s29 = sand.u32 1, %s750_s9   ;;  %p1174_p6 = scmp.ne.s32.totalorder %s1166_s22, 0 }
 0x1b6   : > { %p1175_p4 = scmp.ge.s32.totalorder %s762_s12, 2  ;;  %s463_s30 = scalar_lea.sflag [#allocation4], %s462_s29 }
 0x1b8   : > { %p573_p5 = pnand %p1175_p4, %p1174_p6 }
 0x1ba   : > { %745 = dma.done.wait (!%p573_p5), %s463_s30, 2048  }
 0x1bb   : > { %747 = vsyncadd (!%p573_p5), %s463_s30, 4294965248  ;;  %p16_p0 = scmp.ge.s32.totalorder %s811_s15, 4   ;;  %s1176_s9 = smov %s754_s10 }
 0x1bc   : > { %s1177_s10 = smov %s758_s11  ;;  %s1178_s11 = smov %s823_s18 }
 0x1bd   : > { %s1179_s12 = smov %s811_s15  ;;  %18 = sbr.rel (!%p16_p0) target bundleno = 6 (0x6), region = 78 }
 0x1c4   :  { %468 = vsyncpa [#allocation3], 1 }
 0x1c5   :  { %470 = vsyncpa [#allocation3 + $0x1], 1 }
 0x1c6   :  { %471 = vsyncpa [#allocation4], 1 }
 0x1c7   :  { %473 = vsyncpa [#allocation4 + $0x1], 1 }
 0x1c8   :  { %474 = vsyncpa [#allocation5], 1 }
 0x1c9   :  { %476 = vsyncpa [#allocation5 + $0x1], 1 }

</bundles_post_ra>
